<compile_context>
chip_gen: v7x
topology: tpu7x:2x2x1
jax: 0.10.0
libtpu: 0.0.40
codegen_flags: <defaults>
</compile_context>

<pallas_src>
import functools
import math

import jax
import jax.numpy as jnp
from jax.experimental import pallas as pl
from jax.experimental.pallas import tpu as pltpu


def _round_up(v: int, m: int) -> int:
    return ((v + m - 1) // m) * m


def _cdiv(a: int, b: int) -> int:
    return (a + b - 1) // b


def _vmem_capacity_bytes() -> int:
    """Per-core VMEM capacity; falls back to the conservative 64 MiB (v7x)."""
    try:
        info = pltpu.get_tpu_info()
        cap = getattr(info, "vmem_capacity_bytes", None)
        if cap:
            return int(cap)
    except Exception:
        pass
    return 64 * 1024 * 1024


def prepare_mlp_params(w1, b1, w2, b2):
    """Pad feature dims to lane-dense multiples of 128 and cast weights to bf16.

    Call once at parameter init/load time (weights are static); do NOT rebuild
    per forward call.  Zero padding is exact: tanh(0)=0 and zero weight
    rows/cols contribute nothing.
    """
    F, H = w1.shape
    O = w2.shape[1]
    F_p, H_p, O_p = (_round_up(d, 128) for d in (F, H, O))
    w1_p = jnp.pad(w1, ((0, F_p - F), (0, H_p - H))).astype(jnp.bfloat16)
    w2_p = jnp.pad(w2, ((0, H_p - H), (0, O_p - O))).astype(jnp.bfloat16)
    b1_p = jnp.pad(b1, (0, H_p - H)).astype(jnp.float32).reshape(1, H_p)
    b2_p = jnp.pad(b2, (0, O_p - O)).astype(jnp.float32).reshape(1, O_p)
    return {"w1": w1_p, "b1": b1_p, "w2": w2_p, "b2": b2_p,
            "F": F, "H": H, "O": O}


def _mlp_kernel(x_ref, w1_hbm, b1_hbm, w2_hbm, b2_hbm, o_ref,
                w1_v, b1_v, w2_v, b2_v, acc_ref, sem,
                *, n_chunks, h_chunk):
    # x_ref : (tm, Fp) native dtype     o_ref : (tm, Op) native dtype
    # w*_hbm: raw HBM refs (pl.ANY)     w*_v  : single-buffered VMEM scratch
    # acc_ref: (tm, Op) f32 accumulator for the second matmul.

    # Load weights/biases into VMEM exactly once (grid runs sequentially).
    @pl.when(pl.program_id(0) == 0)
    def _load_weights():
        copies = (
            pltpu.make_async_copy(w1_hbm, w1_v, sem.at[0]),
            pltpu.make_async_copy(b1_hbm, b1_v, sem.at[1]),
            pltpu.make_async_copy(w2_hbm, w2_v, sem.at[2]),
            pltpu.make_async_copy(b2_hbm, b2_v, sem.at[3]),
        )
        for cp in copies:
            cp.start()
        for cp in copies:
            cp.wait()

    # In-kernel cast to bf16 for the MXU (free filler; avoids a wrapper pass).
    x_bf16 = x_ref[...].astype(jnp.bfloat16)

    # Walk the hidden dimension in lane-aligned chunks so tanh (EUP) of one
    # chunk overlaps MXU accumulation of another; hidden stays bf16 in vregs.
    for c in range(n_chunks):
        lo = c * h_chunk
        h = jnp.tanh(
            jnp.dot(x_bf16, w1_v[:, lo:lo + h_chunk],
                    preferred_element_type=jnp.float32)
            + b1_v[:, lo:lo + h_chunk]
        ).astype(jnp.bfloat16)
        contrib = jnp.dot(h, w2_v[lo:lo + h_chunk, :],
                          preferred_element_type=jnp.float32)
        if c == 0:
            acc_ref[...] = contrib
        else:
            acc_ref[...] += contrib

    o_ref[...] = jnp.tanh(acc_ref[...] + b2_v[...]).astype(o_ref.dtype)


def mlp_pallas(x, params, *, tm=512):
    """tanh(tanh(x @ W1 + b1) @ W2 + b2), contracting the last axis of x.

    `params` comes from prepare_mlp_params (padded, bf16 weights).  Leading
    dims of x are flattened into rows; matmuls run on the MXU in bfloat16 with
    float32 accumulation; bias-add and tanh stay float32.
    """
    F, H, O = params["F"], params["H"], params["O"]
    if x.shape[-1] != F:
        raise ValueError(f"x trailing dim {x.shape[-1]} != in_features {F}")
    w1_p, b1_p, w2_p, b2_p = params["w1"], params["b1"], params["w2"], params["b2"]
    F_p, H_p = w1_p.shape
    O_p = w2_p.shape[1]

    lead_shape = x.shape[:-1]
    M = int(math.prod(lead_shape)) if lead_shape else 1
    x2 = x.reshape(M, F)

    # Balanced row tiling: minimal pad, tile a multiple of 16 (bf16 sublanes).
    n_tiles = _cdiv(M, max(int(tm), 16))
    tm_eff = _round_up(_cdiv(M, n_tiles), 16)
    M_pad = tm_eff * n_tiles

    # Only pad x in the wrapper when the shape is ragged; keep native dtype
    # either way (bf16 cast happens inside the kernel).
    if M_pad != M or F_p != F:
        x2 = jnp.pad(x2, ((0, M_pad - M), (0, F_p - F)))

    # Hidden-dim chunking (lane-aligned; 128 always divides H_p).
    h_chunk = next(c for c in (512, 256, 128) if H_p % c == 0)
    n_chunks = H_p // h_chunk

    x_bytes = jnp.dtype(x.dtype).itemsize
    out_bytes = x_bytes

    # VMEM budget: x/out tiles are double-buffered by the pipeline; weights,
    # biases and the accumulator are single-buffered scratch.
    io_bytes = 2 * tm_eff * (F_p * x_bytes + O_p * out_bytes)
    weight_bytes = F_p * H_p * 2 + H_p * O_p * 2 + (H_p + O_p) * 4
    acc_bytes = tm_eff * O_p * 4
    live_bytes = tm_eff * (F_p * 2 + h_chunk * 6)   # bf16 x copy + hidden chunk
    needed = io_bytes + weight_bytes + acc_bytes + live_bytes
    cap = _vmem_capacity_bytes()
    vmem_limit = int(min(cap - 8 * 1024 * 1024,
                         max(32 * 1024 * 1024, 2 * needed)))

    cost = pl.CostEstimate(
        flops=2 * M_pad * (F_p * H_p + H_p * O_p),
        transcendentals=M_pad * (H_p + O_p),
        bytes_accessed=(M_pad * F_p * x_bytes + F_p * H_p * 2 + H_p * O_p * 2
                        + (H_p + O_p) * 4 + M_pad * O_p * out_bytes),
    )

    kernel = functools.partial(_mlp_kernel, n_chunks=n_chunks, h_chunk=h_chunk)

    out_p = pl.pallas_call(
        kernel,
        out_shape=jax.ShapeDtypeStruct((M_pad, O_p), x.dtype),
        grid_spec=pltpu.PrefetchScalarGridSpec(
            num_scalar_prefetch=0,
            grid=(n_tiles,),
            in_specs=[
                pl.BlockSpec((tm_eff, F_p), lambda i: (i, 0)),  # x row tile
                pl.BlockSpec(memory_space=pl.ANY),              # W1 (HBM)
                pl.BlockSpec(memory_space=pl.ANY),              # b1 (HBM)
                pl.BlockSpec(memory_space=pl.ANY),              # W2 (HBM)
                pl.BlockSpec(memory_space=pl.ANY),              # b2 (HBM)
            ],
            out_specs=pl.BlockSpec((tm_eff, O_p), lambda i: (i, 0)),
            scratch_shapes=[
                pltpu.VMEM((F_p, H_p), jnp.bfloat16),   # W1 resident, 1 buffer
                pltpu.VMEM((1, H_p), jnp.float32),      # b1
                pltpu.VMEM((H_p, O_p), jnp.bfloat16),   # W2 resident, 1 buffer
                pltpu.VMEM((1, O_p), jnp.float32),      # b2
                pltpu.VMEM((tm_eff, O_p), jnp.float32), # dot2 accumulator
                pltpu.SemaphoreType.DMA((4,)),
            ],
        ),
        compiler_params=pltpu.CompilerParams(
            dimension_semantics=("arbitrary",),
            vmem_limit_bytes=vmem_limit,
        ),
        cost_estimate=cost,
    )(x2, w1_p, b1_p, w2_p, b2_p)

    out = out_p[:M, :O]
    return out.reshape(*lead_shape, O)


def xavier_uniform(key, fan_in, fan_out, dtype=jnp.float32):
    # Matches torch.nn.init.xavier_uniform_ for a (fan_in, fan_out) matrix.
    bound = (6.0 / (fan_in + fan_out)) ** 0.5
    return jax.random.uniform(key, (fan_in, fan_out), dtype, -bound, bound)


def mlp_reference(x, w1, b1, w2, b2, equation="bsf,fh->bsh"):
    hidden = jnp.tanh(jnp.einsum(equation, x, w1) + b1)
    return jnp.tanh(jnp.einsum(equation, hidden, w2) + b2)


if __name__ == "__main__":
    key = jax.random.PRNGKey(0)

    # --- Case 1: small, aligned shapes (MLP(equation="bsf,fh->bsh", ...)). ---
    B, S = 2, 8
    in_features, hidden_size, out_size = 32, 64, 32
    kx, kw1, kw2, key = jax.random.split(key, 4)

    x = jax.random.normal(kx, (B, S, in_features), dtype=jnp.float32)
    W1 = xavier_uniform(kw1, in_features, hidden_size)
    b1 = jnp.zeros((hidden_size,), jnp.float32)
    W2 = xavier_uniform(kw2, hidden_size, out_size)
    b2 = jnp.zeros((out_size,), jnp.float32)

    params = prepare_mlp_params(W1, b1, W2, b2)   # once, off the hot path
    out = jax.block_until_ready(mlp_pallas(x, params))

    ref = mlp_reference(x, W1, b1, W2, b2)
    assert out.shape == (B, S, out_size)
    # bf16 MXU operands with f32 accumulation -> relaxed tolerance vs f32 ref.
    assert jnp.allclose(out, ref, atol=5e-2, rtol=5e-2), "case 1 mismatch"

    # --- Case 2: ragged dims, multiple grid steps and H chunks. ---
    B2, S2 = 4, 200
    F2, H2, O2 = 33, 300, 17
    kx2, kw1b, kw2b, key = jax.random.split(key, 4)
    x2 = jax.random.normal(kx2, (B2, S2, F2), dtype=jnp.float32)
    W1b = xavier_uniform(kw1b, F2, H2)
    b1b = 0.1 * jnp.ones((H2,), jnp.float32)
    W2b = xavier_uniform(kw2b, H2, O2)
    b2b = -0.05 * jnp.ones((O2,), jnp.float32)

    params2 = prepare_mlp_params(W1b, b1b, W2b, b2b)
    out2 = jax.block_until_ready(mlp_pallas(x2, params2, tm=64))
    ref2 = mlp_reference(x2, W1b, b1b, W2b, b2b)
    assert out2.shape == (B2, S2, O2)
    assert jnp.allclose(out2, ref2, atol=5e-2, rtol=5e-2), "case 2 mismatch"

    print("KERNEL_OK")
</pallas_src>

<mosaic_0001>
module attributes {stable_mosaic.version = 11 : i64} {
  func.func @_mlp_kernel(%arg0: i32, %arg1: memref<16x128xf32, #tpu.memory_space<vmem>>, %arg2: memref<128x128xbf16, #tpu.memory_space<any>>, %arg3: memref<1x128xf32, #tpu.memory_space<any>>, %arg4: memref<128x128xbf16, #tpu.memory_space<any>>, %arg5: memref<1x128xf32, #tpu.memory_space<any>>, %arg6: memref<16x128xf32, #tpu.memory_space<vmem>>, %arg7: memref<128x128xbf16, #tpu.memory_space<vmem>>, %arg8: memref<1x128xf32, #tpu.memory_space<vmem>>, %arg9: memref<128x128xbf16, #tpu.memory_space<vmem>>, %arg10: memref<1x128xf32, #tpu.memory_space<vmem>>, %arg11: memref<16x128xf32, #tpu.memory_space<vmem>>, %arg12: memref<4x!tpu.dma_semaphore, #tpu.memory_space<semaphore_mem>>) attributes {dimension_semantics = [#tpu.dimension_semantics<arbitrary>], iteration_bounds = array<i64: 1>, scalar_prefetch = 0 : i64, scratch_operands = 6 : i64, tpu.core_type = #tpu.core_type<tc>, window_params = [{transform_indices = @transform_0, window_bounds = array<i64: 16, 128>}, {}, {}, {}, {}, {transform_indices = @transform_5, window_bounds = array<i64: 16, 128>}]} {
    %c0_i32 = arith.constant 0 : i32
    %0 = arith.cmpi eq, %arg0, %c0_i32 : i32
    %1 = arith.extui %0 : i1 to i32
    %c0_i32_0 = arith.constant 0 : i32
    %2 = arith.cmpi ne, %1, %c0_i32_0 : i32
    scf.if %2 {
      %c0_i32_17 = arith.constant 0 : i32
      %21 = tpu.memref_slice %arg12[%c0_i32_17] : memref<4x!tpu.dma_semaphore, #tpu.memory_space<semaphore_mem>> -> memref<1x!tpu.dma_semaphore, #tpu.memory_space<semaphore_mem>>
      %22 = tpu.memref_squeeze %21 : memref<1x!tpu.dma_semaphore, #tpu.memory_space<semaphore_mem>> -> memref<!tpu.dma_semaphore, #tpu.memory_space<semaphore_mem>>
      tpu.enqueue_dma source(%arg2 : memref<128x128xbf16, #tpu.memory_space<any>>) target(%arg7 : memref<128x128xbf16, #tpu.memory_space<vmem>>) target_semaphore(%22 : memref<!tpu.dma_semaphore, #tpu.memory_space<semaphore_mem>>)
      %c1_i32 = arith.constant 1 : i32
      %23 = tpu.memref_slice %arg12[%c1_i32] : memref<4x!tpu.dma_semaphore, #tpu.memory_space<semaphore_mem>> -> memref<1x!tpu.dma_semaphore, #tpu.memory_space<semaphore_mem>>
      %24 = tpu.memref_squeeze %23 : memref<1x!tpu.dma_semaphore, #tpu.memory_space<semaphore_mem>> -> memref<!tpu.dma_semaphore, #tpu.memory_space<semaphore_mem>>
      tpu.enqueue_dma source(%arg3 : memref<1x128xf32, #tpu.memory_space<any>>) target(%arg8 : memref<1x128xf32, #tpu.memory_space<vmem>>) target_semaphore(%24 : memref<!tpu.dma_semaphore, #tpu.memory_space<semaphore_mem>>)
      %c2_i32 = arith.constant 2 : i32
      %25 = tpu.memref_slice %arg12[%c2_i32] : memref<4x!tpu.dma_semaphore, #tpu.memory_space<semaphore_mem>> -> memref<1x!tpu.dma_semaphore, #tpu.memory_space<semaphore_mem>>
      %26 = tpu.memref_squeeze %25 : memref<1x!tpu.dma_semaphore, #tpu.memory_space<semaphore_mem>> -> memref<!tpu.dma_semaphore, #tpu.memory_space<semaphore_mem>>
      tpu.enqueue_dma source(%arg4 : memref<128x128xbf16, #tpu.memory_space<any>>) target(%arg9 : memref<128x128xbf16, #tpu.memory_space<vmem>>) target_semaphore(%26 : memref<!tpu.dma_semaphore, #tpu.memory_space<semaphore_mem>>)
      %c3_i32 = arith.constant 3 : i32
      %27 = tpu.memref_slice %arg12[%c3_i32] : memref<4x!tpu.dma_semaphore, #tpu.memory_space<semaphore_mem>> -> memref<1x!tpu.dma_semaphore, #tpu.memory_space<semaphore_mem>>
      %28 = tpu.memref_squeeze %27 : memref<1x!tpu.dma_semaphore, #tpu.memory_space<semaphore_mem>> -> memref<!tpu.dma_semaphore, #tpu.memory_space<semaphore_mem>>
      tpu.enqueue_dma source(%arg5 : memref<1x128xf32, #tpu.memory_space<any>>) target(%arg10 : memref<1x128xf32, #tpu.memory_space<vmem>>) target_semaphore(%28 : memref<!tpu.dma_semaphore, #tpu.memory_space<semaphore_mem>>)
      %c0_i32_18 = arith.constant 0 : i32
      %29 = tpu.memref_slice %arg12[%c0_i32_18] : memref<4x!tpu.dma_semaphore, #tpu.memory_space<semaphore_mem>> -> memref<1x!tpu.dma_semaphore, #tpu.memory_space<semaphore_mem>>
      %30 = tpu.memref_squeeze %29 : memref<1x!tpu.dma_semaphore, #tpu.memory_space<semaphore_mem>> -> memref<!tpu.dma_semaphore, #tpu.memory_space<semaphore_mem>>
      tpu.wait_dma2 semaphore(%30 : memref<!tpu.dma_semaphore, #tpu.memory_space<semaphore_mem>>) src(%arg2 : memref<128x128xbf16, #tpu.memory_space<any>>) dst(%arg7 : memref<128x128xbf16, #tpu.memory_space<vmem>>)
      %c1_i32_19 = arith.constant 1 : i32
      %31 = tpu.memref_slice %arg12[%c1_i32_19] : memref<4x!tpu.dma_semaphore, #tpu.memory_space<semaphore_mem>> -> memref<1x!tpu.dma_semaphore, #tpu.memory_space<semaphore_mem>>
      %32 = tpu.memref_squeeze %31 : memref<1x!tpu.dma_semaphore, #tpu.memory_space<semaphore_mem>> -> memref<!tpu.dma_semaphore, #tpu.memory_space<semaphore_mem>>
      tpu.wait_dma2 semaphore(%32 : memref<!tpu.dma_semaphore, #tpu.memory_space<semaphore_mem>>) src(%arg3 : memref<1x128xf32, #tpu.memory_space<any>>) dst(%arg8 : memref<1x128xf32, #tpu.memory_space<vmem>>)
      %c2_i32_20 = arith.constant 2 : i32
      %33 = tpu.memref_slice %arg12[%c2_i32_20] : memref<4x!tpu.dma_semaphore, #tpu.memory_space<semaphore_mem>> -> memref<1x!tpu.dma_semaphore, #tpu.memory_space<semaphore_mem>>
      %34 = tpu.memref_squeeze %33 : memref<1x!tpu.dma_semaphore, #tpu.memory_space<semaphore_mem>> -> memref<!tpu.dma_semaphore, #tpu.memory_space<semaphore_mem>>
      tpu.wait_dma2 semaphore(%34 : memref<!tpu.dma_semaphore, #tpu.memory_space<semaphore_mem>>) src(%arg4 : memref<128x128xbf16, #tpu.memory_space<any>>) dst(%arg9 : memref<128x128xbf16, #tpu.memory_space<vmem>>)
      %c3_i32_21 = arith.constant 3 : i32
      %35 = tpu.memref_slice %arg12[%c3_i32_21] : memref<4x!tpu.dma_semaphore, #tpu.memory_space<semaphore_mem>> -> memref<1x!tpu.dma_semaphore, #tpu.memory_space<semaphore_mem>>
      %36 = tpu.memref_squeeze %35 : memref<1x!tpu.dma_semaphore, #tpu.memory_space<semaphore_mem>> -> memref<!tpu.dma_semaphore, #tpu.memory_space<semaphore_mem>>
      tpu.wait_dma2 semaphore(%36 : memref<!tpu.dma_semaphore, #tpu.memory_space<semaphore_mem>>) src(%arg5 : memref<1x128xf32, #tpu.memory_space<any>>) dst(%arg10 : memref<1x128xf32, #tpu.memory_space<vmem>>)
    } else {
    }
    %c0 = arith.constant 0 : index
    %c0_1 = arith.constant 0 : index
    %3 = vector.load %arg1[%c0, %c0_1] : memref<16x128xf32, #tpu.memory_space<vmem>>, vector<16x128xf32>
    %4 = arith.truncf %3 : vector<16x128xf32> to vector<16x128xbf16>
    %c0_2 = arith.constant 0 : index
    %c0_3 = arith.constant 0 : index
    %5 = vector.load %arg7[%c0_2, %c0_3] : memref<128x128xbf16, #tpu.memory_space<vmem>>, vector<128x128xbf16>
    %cst = arith.constant dense<0.000000e+00> : vector<16x128xf32>
    %6 = tpu.matmul %4, %5, %cst {dimension_numbers = #tpu.dot_dimension_numbers<[1], [0], [0], [1], [0, 0, 1, 1], [], []>} : vector<16x128xbf16>, vector<128x128xbf16>, vector<16x128xf32> -> vector<16x128xf32>
    %c0_4 = arith.constant 0 : index
    %c0_5 = arith.constant 0 : index
    %7 = vector.load %arg8[%c0_4, %c0_5] : memref<1x128xf32, #tpu.memory_space<vmem>>, vector<1x128xf32>
    %8 = vector.broadcast %7 : vector<1x128xf32> to vector<16x128xf32>
    %9 = arith.addf %6, %8 : vector<16x128xf32>
    %10 = math.tanh %9 : vector<16x128xf32>
    %11 = arith.truncf %10 : vector<16x128xf32> to vector<16x128xbf16>
    %c0_6 = arith.constant 0 : index
    %c0_7 = arith.constant 0 : index
    %12 = vector.load %arg9[%c0_6, %c0_7] : memref<128x128xbf16, #tpu.memory_space<vmem>>, vector<128x128xbf16>
    %cst_8 = arith.constant dense<0.000000e+00> : vector<16x128xf32>
    %13 = tpu.matmul %11, %12, %cst_8 {dimension_numbers = #tpu.dot_dimension_numbers<[1], [0], [0], [1], [0, 0, 1, 1], [], []>} : vector<16x128xbf16>, vector<128x128xbf16>, vector<16x128xf32> -> vector<16x128xf32>
    %c0_9 = arith.constant 0 : index
    %c0_10 = arith.constant 0 : index
    %14 = vector.load %arg11[%c0_9, %c0_10] : memref<16x128xf32, #tpu.memory_space<vmem>>, vector<16x128xf32>
    tpu.vector_store %arg11[%c0_9, %c0_10], %13 {strides = array<i32>} : memref<16x128xf32, #tpu.memory_space<vmem>>, vector<16x128xf32>,
    %c0_11 = arith.constant 0 : index
    %c0_12 = arith.constant 0 : index
    %15 = vector.load %arg11[%c0_11, %c0_12] : memref<16x128xf32, #tpu.memory_space<vmem>>, vector<16x128xf32>
    %c0_13 = arith.constant 0 : index
    %c0_14 = arith.constant 0 : index
    %16 = vector.load %arg10[%c0_13, %c0_14] : memref<1x128xf32, #tpu.memory_space<vmem>>, vector<1x128xf32>
    %17 = vector.broadcast %16 : vector<1x128xf32> to vector<16x128xf32>
    %18 = arith.addf %15, %17 : vector<16x128xf32>
    %19 = math.tanh %18 : vector<16x128xf32>
    %c0_15 = arith.constant 0 : index
    %c0_16 = arith.constant 0 : index
    %20 = vector.load %arg6[%c0_15, %c0_16] : memref<16x128xf32, #tpu.memory_space<vmem>>, vector<16x128xf32>
    tpu.vector_store %arg6[%c0_15, %c0_16], %19 {strides = array<i32>} : memref<16x128xf32, #tpu.memory_space<vmem>>, vector<16x128xf32>,
    return
  }
  func.func @transform_0(%arg0: i32) -> (i32, i32) {
    %c0_i32 = arith.constant 0 : i32
    %c0_i32_0 = arith.constant 0 : i32
    return %arg0, %c0_i32 : i32, i32
  }
  func.func @transform_5(%arg0: i32) -> (i32, i32) {
    %c0_i32 = arith.constant 0 : i32
    %c0_i32_0 = arith.constant 0 : i32
    return %arg0, %c0_i32 : i32, i32
  }
}

</mosaic_0001>

<bundles_post_ra>
// kernel: tpu_custom_call.1
= control target key start
LH: loop header
LB: loop body
LE: loop exit
PB: predicated region body
PF: predicated region fallthrough
CT: control target
= control target key end

     0   :  { %10 = vsyncpa [#allocation9], 0  ;;  %s626_s0 = inlined_call_operand.hbm [shape: f32[16,128], index: 0, kind: input, shape index: {}]   ;;  %s627_s1 = inlined_call_operand.hbm [shape: bf16[128,128], index: 1, kind: input, shape index: {}]   ;;  %s628_s2 = inlined_call_operand.vmem [shape: f32[1,128], index: 2, kind: input, shape index: {}]   ;;  %s629_s3 = inlined_call_operand.hbm [shape: bf16[128,128], index: 3, kind: input, shape index: {}]   ;;  %s630_s4 = inlined_call_operand.vmem [shape: f32[1,128], index: 4, kind: input, shape index: {}]   ;;  %s631_s5 = inlined_call_operand.hbm [shape: f32[16,128], index: 5, kind: output, shape index: {}]  }
   0x1   :  { %11 = vsyncpa [#allocation10], 0  ;;  %s528_s18 = smov [#allocation8]   ;;  %s428_s22 = scalar_lea.hbm %s626_s0, 256 }
   0x2   :  { %s17_s19 = sshll.u32 %s528_s18, 4  ;;  %p429_p0 = scmp.ne.s32.totalorder %s626_s0, %s428_s22  ;;  %s18_s19 = int_to_ptr.vmem [resolvable:$true] %s17_s19 }
   0x3   :  { %p432_p1 = scmp.lt.u32.totalorder %s428_s22, %s626_s0 }
   0x5   :  { %p434_p2 = pnand %p432_p1, %p429_p0 }
   0x7   :  { %437 = shalt.err (!%p434_p2)
}
   0x8   :  { %s438_s27 = scalar_lea.vmem %s18_s19, 256  ;;  %p443_p4 = scmp.lt.s32.totalorder %s18_s19, %s18_s19 }
   0x9   :  { %p439_p3 = scmp.ne.s32.totalorder %s18_s19, %s438_s27  ;;  %p444_p5 = scmp.lt.s32.totalorder %s438_s27, %s438_s27 }
   0xb   :  { %p445_p6 = por %p444_p5, %p443_p4 }
   0xd   :  { %p446_p7 = pnand %p445_p6, %p439_p3 }
   0xf   :  { %449 = shalt.err (!%p446_p7)
}
  0x10   :  { %s529_s28 = smov 128   ;;  %s530_s29 = smov 8  }
  0x11   :  { %23 = dma.hbm_to_vmem [thread:$0]  %s626_s0, 256, %s18_s19, [#allocation9], %s529_s28, %s529_s28, %s530_s29  }
  0x12   :  { %516 = dma.done.wait [#allocation9], 256  }
  0x13   :  { %517 = vsyncadd [#allocation9], 4294967040  ;;  %s531_s7 = smov [#allocation2]   ;;  %s450_s11 = scalar_lea.hbm %s627_s1, 1024 }
  0x14   :  { %s39_s8 = sshll.u32 %s531_s7, 4  ;;  %p451_p8 = scmp.ne.s32.totalorder %s627_s1, %s450_s11  ;;  %s40_s8 = int_to_ptr.vmem [resolvable:$true] %s39_s8 }
  0x15   :  { %p454_p9 = scmp.lt.u32.totalorder %s450_s11, %s627_s1 }
  0x17   :  { %p456_p10 = pnand %p454_p9, %p451_p8 }
  0x19   :  { %459 = shalt.err (!%p456_p10)  }
  0x1a   :  { %s460_s0 = scalar_lea.vmem %s40_s8, 1024  ;;  %p465_p12 = scmp.lt.s32.totalorder %s40_s8, %s40_s8 }
  0x1b   :  { %p461_p11 = scmp.ne.s32.totalorder %s40_s8, %s460_s0  ;;  %p466_p13 = scmp.lt.s32.totalorder %s460_s0, %s460_s0 }
  0x1d   :  { %p467_p0 = por %p466_p13, %p465_p12 }
  0x1f   :  { %p468_p1 = pnand %p467_p0, %p461_p11 }
  0x21   :  { %471 = shalt.err (!%p468_p1)  }
  0x22   :  { %42 = dma.hbm_to_vmem [thread:$0]  %s627_s1, 1024, %s40_s8, [#allocation7]  ;;  %v61_v0 = vld [vmem:[%s628_s2] sm:$0x1] }
  0x23   :  { %62 = vst [vmem:[#allocation3] sm:$0x1] %v61_v0 }
  0x24   :  { %87 = vsyncadd [#allocation7 + $0x1], 16  ;;  %v118_v1 = vld [vmem:[%s630_s4] sm:$0x1]  ;;  %s532_s22 = smov [#allocation4]   ;;  %s472_s26 = scalar_lea.hbm %s629_s3, 1024 }
  0x25   :  { %s96_s23 = sshll.u32 %s532_s22, 4  ;;  %119 = vst [vmem:[#allocation5] sm:$0x1] %v118_v1  ;;  %p473_p2 = scmp.ne.s32.totalorder %s629_s3, %s472_s26  ;;  %s97_s23 = int_to_ptr.vmem [resolvable:$true] %s96_s23 }
  0x26   :  { %p476_p3 = scmp.lt.u32.totalorder %s472_s26, %s629_s3 }
  0x28   :  { %p478_p4 = pnand %p476_p3, %p473_p2 }
  0x2a   :  { %481 = shalt.err (!%p478_p4)  }
  0x2b   :  { %s482_s6 = scalar_lea.vmem %s97_s23, 1024  ;;  %p487_p6 = scmp.lt.s32.totalorder %s97_s23, %s97_s23 }
  0x2c   :  { %p483_p5 = scmp.ne.s32.totalorder %s97_s23, %s482_s6  ;;  %p488_p7 = scmp.lt.s32.totalorder %s482_s6, %s482_s6 }
  0x2e   :  { %p489_p8 = por %p488_p7, %p487_p6 }
  0x30   :  { %p490_p9 = pnand %p489_p8, %p483_p5 }
  0x32   :  { %493 = shalt.err (!%p490_p9)  }
  0x33   :  { %99 = dma.hbm_to_vmem [thread:$0]  %s629_s3, 1024, %s97_s23, [#allocation7 + $0x2] }
  0x34   :  { %144 = vsyncadd [#allocation7 + $0x3], 16 }
  0x35   :  { %518 = dma.done.wait [#allocation7], 1024 }
  0x36   :  { %519 = vsyncadd [#allocation7], 4294966272 }
  0x37   :  { %520 = dma.done.wait [#allocation7 + $0x1], 16 }
  0x38   :  { %521 = vsyncadd [#allocation7 + $0x1], 4294967280 }
  0x39   :  { %522 = dma.done.wait [#allocation7 + $0x2], 1024 }
  0x3a   :  { %523 = vsyncadd [#allocation7 + $0x2], 4294966272 }
  0x3b   :  { %524 = dma.done.wait [#allocation7 + $0x3], 16 }
  0x3c   :  { %525 = vsyncadd [#allocation7 + $0x3], 4294967280  ;;  %v533_v2 = vmov 0.0   ;;  %vm534_vm0 = vmmov 0   ;;  %v159_v3 = vld [vmem:[#allocation2] sm:$0xff]  ;;  %v160_v4 = vld [vmem:[#allocation2 + $0x8] sm:$0xff] }
  0x3d   :  { %372 = vmatprep.subr.bf16.mxu0 %v533_v2  ;;  %388 = vmatprep.mubr.msk.bf16.mxu0 %vm534_vm0, %v533_v2  ;;  %v218_v5 = vld [vmem:[#allocation4] sm:$0xff]  ;;  %v219_v6 = vld [vmem:[#allocation4 + $0x8] sm:$0xff]  ;;  %v220_v8 = vld [vmem:[#allocation4 + $0x10] sm:$0xff]  ;;  %s535_s3 = smov [#allocation11]  }
  0x3e   :  { %392 = vmatprep.subr.bf16.mxu1 %v533_v2  ;;  %408 = vmatprep.mubr.msk.bf16.mxu1 %vm534_vm0, %v533_v2  ;;  %v161_v7 = vld [vmem:[#allocation2 + $0x10] sm:$0xff]  ;;  %v162_v9 = vld [vmem:[#allocation2 + $0x18] sm:$0xff]  ;;  %v163_v11 = vld [vmem:[#allocation2 + $0x20] sm:$0xff]  ;;  %s289_s8 = sshll.u32 %s535_s3, 4  ;;  %s290_s8 = int_to_ptr.vmem [resolvable:$true] %s289_s8 }
  0x3f   :  { %373 = vmatpush3.bf16.msra.mxu0 %v159_v3  ;;  %393 = vmatpush3.bf16.msra.mxu1 %v218_v5  ;;  %v221_v10 = vld [vmem:[#allocation4 + $0x18] sm:$0xff]  ;;  %v164_v12 = vld [vmem:[#allocation2 + $0x28] sm:$0xff]  ;;  %v165_v13 = vld [vmem:[#allocation2 + $0x30] sm:$0xff]  ;;  %s494_s9 = scalar_lea.vmem %s290_s8, 256  ;;  %p499_p11 = scmp.lt.s32.totalorder %s290_s8, %s290_s8 }
  0x40   :  { %374 = vmatprep.subr.bf16.mxu0 %v533_v2  ;;  %394 = vmatprep.subr.bf16.mxu1 %v533_v2  ;;  %v156_v14 = vld [vmem:[#allocation8] sm:$0xff]  ;;  %v157_v15 = vld [vmem:[#allocation8 + $0x8] sm:$0xff]  ;;  %v166_v16 = vld [vmem:[#allocation2 + $0x38] sm:$0xff]  ;;  %p495_p10 = scmp.ne.s32.totalorder %s290_s8, %s494_s9  ;;  %p500_p12 = scmp.lt.s32.totalorder %s494_s9, %s494_s9 }
  0x41   :  { %v158_v17 = vpack.c.bf16 %v157_v15, %v156_v14  ;;  %v222_v18 = vld [vmem:[#allocation4 + $0x20] sm:$0xff]  ;;  %v223_v19 = vld [vmem:[#allocation4 + $0x28] sm:$0xff]  ;;  %v224_v20 = vld [vmem:[#allocation4 + $0x30] sm:$0xff] }
  0x42   :  { %v225_v21 = vld [vmem:[#allocation4 + $0x38] sm:$0xff]  ;;  %v349_v32 = vld [vmem:[#allocation5] ss:$0 sm:$0xff]  ;;  %p501_p13 = por %p500_p12, %p499_p11 }
  0x43   :  { %375 = vmatpush3.bf16.msra.mxu0 %v160_v4  ;;  %395 = vmatpush3.bf16.msra.mxu1 %v219_v6  ;;  %v348_v22 = vld [vmem:[#allocation3] ss:$0 sm:$0xff] }
  0x44   :  { %376 = vmatprep.subr.bf16.mxu0 %v533_v2  ;;  %396 = vmatprep.subr.bf16.mxu1 %v533_v2  ;;  %p502_p0 = pnand %p501_p13, %p495_p10 }
  0x47   :  { %377 = vmatpush3.bf16.msra.mxu0 %v161_v7  ;;  %397 = vmatpush3.bf16.msra.mxu1 %v220_v8 }
  0x48   :  { %378 = vmatprep.subr.bf16.mxu0 %v533_v2  ;;  %398 = vmatprep.subr.bf16.mxu1 %v533_v2 }
  0x4b   :  { %379 = vmatpush3.bf16.msra.mxu0 %v162_v9  ;;  %399 = vmatpush3.bf16.msra.mxu1 %v221_v10 }
  0x4c   :  { %380 = vmatprep.subr.bf16.mxu0 %v533_v2  ;;  %400 = vmatprep.subr.bf16.mxu1 %v533_v2 }
  0x4f   :  { %381 = vmatpush3.bf16.msra.mxu0 %v163_v11  ;;  %401 = vmatpush3.bf16.msra.mxu1 %v222_v18 }
  0x50   :  { %382 = vmatprep.subr.bf16.mxu0 %v533_v2  ;;  %402 = vmatprep.subr.bf16.mxu1 %v533_v2 }
  0x53   :  { %383 = vmatpush3.bf16.msra.mxu0 %v164_v12  ;;  %403 = vmatpush3.bf16.msra.mxu1 %v223_v19 }
  0x54   :  { %384 = vmatprep.subr.bf16.mxu0 %v533_v2  ;;  %404 = vmatprep.subr.bf16.mxu1 %v533_v2 }
  0x57   :  { %385 = vmatpush3.bf16.msra.mxu0 %v165_v13  ;;  %405 = vmatpush3.bf16.msra.mxu1 %v224_v20 }
  0x58   :  { %386 = vmatprep.subr.bf16.mxu0 %v533_v2  ;;  %406 = vmatprep.subr.bf16.mxu1 %v533_v2 }
  0x5b   :  { %387 = vmatpush3.bf16.msra.mxu0 %v166_v16  ;;  %407 = vmatpush3.bf16.msra.mxu1 %v225_v21 }
  0x5e   :  { %389 = vmatmul.mubr.bf16.vlgmr.msra.gmra.mrb[0].mxu0 %v158_v17 }
 0x131   :  { %v208_v23 = vpop.f32.mrb[0].mxu0 }
 0x132   :  { %v209_v24 = vadd.f32 %v348_v22, %v208_v23  ;;  %v390_v25 = vpop.f32.mrb[1].mxu0 }
 0x133   :  { %v211_v26 = vpop.f32.mrb[2].mxu0 }
 0x134   :  { %v212_v27 = vadd.f32 %v348_v22, %v211_v26  ;;  %v391_v28 = vpop.f32.mrb[3].mxu0  ;;  %420 = vtanh.f32 %v209_v24 }
 0x136   :  { %422 = vtanh.f32 %v212_v27 }
 0x13e   :  { %v421_v29 = vpop.eup %420 }
 0x140   :  { %v423_v30 = vpop.eup %422 }
 0x141   :  { %v217_v31 = vpack.c.bf16 %v423_v30, %v421_v29 }
 0x143   :  { %409 = vmatmul.mubr.bf16.vlgmr.msra.gmra.mrb[0].mxu1 %v217_v31 }
 0x216   :  { %v260_v33 = vpop.f32.mrb[0].mxu1 }
 0x217   :  { %v278_v34 = vadd.f32 %v349_v32, %v260_v33  ;;  %v410_v35 = vpop.f32.mrb[1].mxu1 }
 0x218   :  { %v263_v36 = vpop.f32.mrb[2].mxu1 }
 0x219   :  { %424 = vtanh.f32 %v278_v34  ;;  %v279_v37 = vadd.f32 %v349_v32, %v263_v36  ;;  %v411_v38 = vpop.f32.mrb[3].mxu1 }
 0x21b   :  { %426 = vtanh.f32 %v279_v37 }
 0x223   :  { %v425_v39 = vpop.eup %424 }
 0x224   :  { %282 = vst [vmem:[#allocation11] sm:$0xff] %v425_v39 }
 0x225   :  { %v427_v40 = vpop.eup %426 }
 0x226   :  { %283 = vst [vmem:[#allocation11 + $0x8] sm:$0xff] %v427_v40 }
 0x227   :  { %505 = shalt.err (!%p502_p0)
}
 0x228   :  { %s506_s12 = scalar_lea.hbm %s631_s5, 256 }
 0x229   :  { %p507_p1 = scmp.ne.s32.totalorder %s631_s5, %s506_s12  ;;  %p510_p2 = scmp.lt.u32.totalorder %s506_s12, %s631_s5 }
 0x22b   :  { %p512_p3 = pnand %p510_p2, %p507_p1 }
 0x22d   :  { %515 = shalt.err (!%p512_p3)
}
 0x22e   :  { %295 = dma.vmem_to_hbm [thread:$0]  %s290_s8, 256, %s631_s5, [#allocation10], %s529_s28, %s529_s28, %s530_s29  }
 0x22f   :  { %526 = dma.done.wait [#allocation10], 256  }
 0x230   :  { %527 = vsyncadd [#allocation10], 4294967040 }
 0x231   :  { %299 = vsyncpa [#allocation9], 1 }
 0x232   :  { %300 = vsyncpa [#allocation10], 1 }
 0x233   :  { %301 = vsyncmov [#allocation7] }
 0x236   :  { %s302_s18 = vpop.sfrf %301 }
 0x237   :  { %p350_p4 = scmp.ne.s32.totalorder %s302_s18, 0 }
 0x239   :  { %306 = shalt.err (%p350_p4)  }
 0x23a   :  { %308 = vsyncmov [#allocation7 + $0x1] }
 0x23d   :  { %s309_s19 = vpop.sfrf %308 }
 0x23e   :  { %p351_p5 = scmp.ne.s32.totalorder %s309_s19, 0 }
 0x240   :  { %313 = shalt.err (%p351_p5)  }
 0x241   :  { %315 = vsyncmov [#allocation7 + $0x2] }
 0x244   :  { %s316_s20 = vpop.sfrf %315 }
 0x245   :  { %p352_p6 = scmp.ne.s32.totalorder %s316_s20, 0 }
 0x247   :  { %320 = shalt.err (%p352_p6)  }
 0x248   :  { %322 = vsyncmov [#allocation7 + $0x3] }
 0x24b   :  { %s323_s21 = vpop.sfrf %322 }
 0x24c   :  { %p353_p7 = scmp.ne.s32.totalorder %s323_s21, 0 }
 0x24e   :  { %327 = shalt.err (%p353_p7)  }

</bundles_post_ra>
